<compile_context>
chip_gen: v7x
topology: tpu7x:2x2x1
jax: 0.10.0
libtpu: 0.0.40
codegen_flags: <defaults>
</compile_context>

<pallas_src>
import jax
import jax.numpy as jnp
from jax.experimental import pallas as pl
from jax.experimental.pallas import tpu as pltpu

_LANES = 128                      # vreg lane width (last dim of the slab)
_TARGET_BLOCK_BYTES = 2 << 20     # ~2 MiB per pipeline buffer


def _sublanes_for(dtype) -> int:
    """Minimal sublane multiple for native packed (sublane, 128) tiles."""
    itemsize = jnp.dtype(dtype).itemsize
    if itemsize >= 4:
        return 8
    if itemsize == 2:
        return 16
    return 32


# ----------------------------------------------------------------------------
# Pallas kernel: elementwise swish on one lane-dense (tile_rows, 128) block.
# ----------------------------------------------------------------------------
def _swish_kernel(x_ref, o_ref):
    x = x_ref[...]
    if x.dtype == jnp.bfloat16:
        # Native bf16 VPU/EUP path (v6e/v7x); Mosaic legalizes on v5e.
        half = jnp.bfloat16(0.5)
        one = jnp.bfloat16(1.0)
        o_ref[...] = x * (half * (jnp.tanh(half * x) + one))
    else:
        xf = x.astype(jnp.float32)
        # sigmoid(x) = 0.5 * (tanh(0.5*x) + 1): a single EUP transcendental.
        sig = 0.5 * (jnp.tanh(0.5 * xf) + 1.0)
        o_ref[...] = (xf * sig).astype(o_ref.dtype)


# ----------------------------------------------------------------------------
# Wrapper: flatten -> lane-dense slab -> cdiv-grid pallas_call -> reshape back
# ----------------------------------------------------------------------------
def swish(x):
    orig_shape = x.shape
    orig_dtype = x.dtype
    n = x.size
    if n == 0:
        return x

    itemsize = jnp.dtype(orig_dtype).itemsize
    sublanes = _sublanes_for(orig_dtype)

    # Minimal (sublane, 128) alignment pad only; no tile-multiple rounding.
    rows = pl.cdiv(n, _LANES)
    rows = pl.cdiv(rows, sublanes) * sublanes
    padded = rows * _LANES

    flat = x.reshape(-1)
    if padded != n:
        flat = jnp.pad(flat, (0, padded - n))
    x2d = flat.reshape(rows, _LANES)

    # ~2 MiB per buffer, rounded to a sublane multiple; ragged last grid block
    # is masked by Pallas (cdiv grid), so rows need not divide evenly.
    tile_rows = _TARGET_BLOCK_BYTES // (_LANES * itemsize)
    tile_rows = max(sublanes, (tile_rows // sublanes) * sublanes)
    tile_rows = min(tile_rows, rows)
    grid = (pl.cdiv(rows, tile_rows),)

    cost = pl.CostEstimate(
        flops=4 * padded,            # two muls, one add, one scale per element
        transcendentals=padded,      # one tanh per element
        bytes_accessed=2 * padded * itemsize,
    )

    out = pl.pallas_call(
        _swish_kernel,
        out_shape=jax.ShapeDtypeStruct((rows, _LANES), orig_dtype),
        grid=grid,
        in_specs=[pl.BlockSpec((tile_rows, _LANES), lambda i: (i, 0))],
        out_specs=pl.BlockSpec((tile_rows, _LANES), lambda i: (i, 0)),
        compiler_params=pltpu.CompilerParams(
            dimension_semantics=("parallel",)),
        cost_estimate=cost,
    )(x2d)

    out_flat = out.reshape(-1)
    if padded != n:
        out_flat = out_flat[:n]
    return out_flat.reshape(orig_shape)


# ----------------------------------------------------------------------------
# Pure-JAX reference (mirrors torch: x * torch.sigmoid(x))
# ----------------------------------------------------------------------------
def _swish_ref(x):
    return x * jax.nn.sigmoid(x)


# ----------------------------------------------------------------------------
if __name__ == "__main__":
    key = jax.random.PRNGKey(0)
    k1, k2, k3 = jax.random.split(key, 3)

    # Primary test: small 4-D activation tensor (2048 elems -> one 16x128 slab).
    x = jax.random.normal(k1, (2, 4, 16, 16), dtype=jnp.float32)
    y = swish(x)
    jax.block_until_ready(y)
    y_ref = _swish_ref(x)
    assert y.shape == x.shape and y.dtype == x.dtype
    assert jnp.allclose(y, y_ref, atol=2e-6, rtol=2e-6)

    # Ragged size: exercises the minimal alignment pad + trailing slice.
    x2 = jax.random.normal(k2, (3, 50), dtype=jnp.float32)
    y2 = swish(x2)
    jax.block_until_ready(y2)
    assert jnp.allclose(y2, _swish_ref(x2), atol=2e-6, rtol=2e-6)

    # bf16 path: native half-precision VPU/EUP compute, 16-row sublane align.
    x3 = jax.random.normal(k3, (4, 96), dtype=jnp.bfloat16)
    y3 = swish(x3)
    jax.block_until_ready(y3)
    assert y3.dtype == jnp.bfloat16
    assert jnp.allclose(y3.astype(jnp.float32),
                        _swish_ref(x3.astype(jnp.float32)),
                        atol=2e-2, rtol=2e-2)

    print("KERNEL_OK")
</pallas_src>

<mosaic_0001>
module attributes {stable_mosaic.version = 11 : i64} {
  func.func @_swish_kernel(%arg0: i32, %arg1: memref<16x128xf32, #tpu.memory_space<vmem>>, %arg2: memref<16x128xf32, #tpu.memory_space<vmem>>) attributes {dimension_semantics = [#tpu.dimension_semantics<parallel>], iteration_bounds = array<i64: 1>, scalar_prefetch = 0 : i64, scratch_operands = 0 : i64, tpu.core_type = #tpu.core_type<tc>, window_params = [{transform_indices = @transform_0, window_bounds = array<i64: 16, 128>}, {transform_indices = @transform_1, window_bounds = array<i64: 16, 128>}]} {
    %c0 = arith.constant 0 : index
    %c0_0 = arith.constant 0 : index
    %0 = vector.load %arg1[%c0, %c0_0] : memref<16x128xf32, #tpu.memory_space<vmem>>, vector<16x128xf32>
    %cst = arith.constant 5.000000e-01 : f32
    %1 = vector.broadcast %cst : f32 to vector<16x128xf32>
    %2 = arith.mulf %1, %0 : vector<16x128xf32>
    %3 = math.tanh %2 : vector<16x128xf32>
    %cst_1 = arith.constant 1.000000e+00 : f32
    %4 = vector.broadcast %cst_1 : f32 to vector<16x128xf32>
    %5 = arith.addf %3, %4 : vector<16x128xf32>
    %cst_2 = arith.constant 5.000000e-01 : f32
    %6 = vector.broadcast %cst_2 : f32 to vector<16x128xf32>
    %7 = arith.mulf %6, %5 : vector<16x128xf32>
    %8 = arith.mulf %0, %7 : vector<16x128xf32>
    %c0_3 = arith.constant 0 : index
    %c0_4 = arith.constant 0 : index
    %9 = vector.load %arg2[%c0_3, %c0_4] : memref<16x128xf32, #tpu.memory_space<vmem>>, vector<16x128xf32>
    tpu.vector_store %arg2[%c0_3, %c0_4], %8 {strides = array<i32>} : memref<16x128xf32, #tpu.memory_space<vmem>>, vector<16x128xf32>,
    return
  }
  func.func @transform_0(%arg0: i32) -> (i32, i32) {
    %c0_i32 = arith.constant 0 : i32
    %c0_i32_0 = arith.constant 0 : i32
    return %arg0, %c0_i32 : i32, i32
  }
  func.func @transform_1(%arg0: i32) -> (i32, i32) {
    %c0_i32 = arith.constant 0 : i32
    %c0_i32_0 = arith.constant 0 : i32
    return %arg0, %c0_i32 : i32, i32
  }
}

</mosaic_0001>

<bundles_post_ra>
// kernel: tpu_custom_call.1
= control target key start
LH: loop header
LB: loop body
LE: loop exit
PB: predicated region body
PF: predicated region fallthrough
CT: control target
= control target key end

     0   :  { %6 = vsyncpa [#allocation3], 0  ;;  %s154_s0 = inlined_call_operand.hbm [shape: f32[16,128], index: 0, kind: input, shape index: {}]   ;;  %s155_s1 = inlined_call_operand.hbm [shape: f32[16,128], index: 1, kind: output, shape index: {}]  }
   0x1   :  { %7 = vsyncpa [#allocation4], 0  ;;  %s110_s6 = smov [#allocation2]   ;;  %s62_s10 = scalar_lea.hbm %s154_s0, 256 }
   0x2   :  { %s13_s7 = sshll.u32 %s110_s6, 4  ;;  %p63_p0 = scmp.ne.s32.totalorder %s154_s0, %s62_s10  ;;  %s14_s7 = int_to_ptr.vmem [resolvable:$true] %s13_s7 }
   0x3   :  { %p66_p1 = scmp.lt.u32.totalorder %s62_s10, %s154_s0 }
   0x5   :  { %p68_p2 = pnand %p66_p1, %p63_p0 }
   0x7   :  { %71 = shalt.err (!%p68_p2)
}
   0x8   :  { %s72_s15 = scalar_lea.vmem %s14_s7, 256  ;;  %p77_p4 = scmp.lt.s32.totalorder %s14_s7, %s14_s7 }
   0x9   :  { %p73_p3 = scmp.ne.s32.totalorder %s14_s7, %s72_s15  ;;  %p78_p5 = scmp.lt.s32.totalorder %s72_s15, %s72_s15 }
   0xb   :  { %p79_p6 = por %p78_p5, %p77_p4 }
   0xd   :  { %p80_p7 = pnand %p79_p6, %p73_p3 }
   0xf   :  { %83 = shalt.err (!%p80_p7)
}
  0x10   :  { %s111_s16 = smov 128   ;;  %s112_s17 = smov 8  }
  0x11   :  { %19 = dma.hbm_to_vmem [thread:$0]  %s154_s0, 256, %s14_s7, [#allocation3], %s111_s16, %s111_s16, %s112_s17  }
  0x12   :  { %106 = dma.done.wait [#allocation3], 256  }
  0x13   :  { %107 = vsyncadd [#allocation3], 4294967040  ;;  %v23_v0 = vld [vmem:[#allocation2] sm:$0xff]  ;;  %v24_v1 = vld [vmem:[#allocation2 + $0x8] sm:$0xff]  ;;  %s113_s20 = smov [#allocation5]  }
  0x14   :  { %v25_v2 = vmul.f32 0.5, %v23_v0  ;;  %v26_v3 = vmul.f32 0.5, %v24_v1  ;;  %s42_s21 = sshll.u32 %s113_s20, 4  ;;  %s43_s21 = int_to_ptr.vmem [resolvable:$true] %s42_s21 }
  0x15   :  { %s84_s0 = scalar_lea.vmem %s43_s21, 256  ;;  %p89_p9 = scmp.lt.s32.totalorder %s43_s21, %s43_s21 }
  0x16   :  { %58 = vtanh.f32 %v25_v2  ;;  %p85_p8 = scmp.ne.s32.totalorder %s43_s21, %s84_s0  ;;  %p90_p10 = scmp.lt.s32.totalorder %s84_s0, %s84_s0 }
  0x17   :  { %60 = vtanh.f32 %v26_v3 }
  0x18   :  { %p91_p11 = por %p90_p10, %p89_p9 }
  0x1a   :  { %p92_p12 = pnand %p91_p11, %p85_p8 }
  0x20   :  { %v59_v4 = vpop.eup %58 }
  0x21   :  { %v61_v5 = vpop.eup %60  ;;  %v29_v6 = vadd.f32 1.0, %v59_v4 }
  0x22   :  { %v30_v7 = vadd.f32 1.0, %v61_v5 }
  0x23   :  { %v31_v8 = vmul.f32 0.5, %v29_v6 }
  0x24   :  { %v32_v9 = vmul.f32 0.5, %v30_v7 }
  0x25   :  { %v33_v10 = vmul.f32 %v31_v8, %v23_v0 }
  0x26   :  { %v34_v11 = vmul.f32 %v32_v9, %v24_v1 }
  0x27   :  { %35 = vst [vmem:[#allocation5] sm:$0xff] %v33_v10 }
  0x28   :  { %36 = vst [vmem:[#allocation5 + $0x8] sm:$0xff] %v34_v11 }
  0x29   :  { %95 = shalt.err (!%p92_p12)
}
  0x2a   :  { %s96_s24 = scalar_lea.hbm %s155_s1, 256 }
  0x2b   :  { %p97_p13 = scmp.ne.s32.totalorder %s155_s1, %s96_s24  ;;  %p100_p0 = scmp.lt.u32.totalorder %s96_s24, %s155_s1 }
  0x2d   :  { %p102_p1 = pnand %p100_p0, %p97_p13 }
  0x2f   :  { %105 = shalt.err (!%p102_p1)
}
  0x30   :  { %48 = dma.vmem_to_hbm [thread:$0]  %s43_s21, 256, %s155_s1, [#allocation4], %s111_s16, %s111_s16, %s112_s17  }
  0x31   :  { %108 = dma.done.wait [#allocation4], 256  }
  0x32   :  { %109 = vsyncadd [#allocation4], 4294967040 }
  0x33   :  { %52 = vsyncpa [#allocation3], 1 }
  0x34   :  { %53 = vsyncpa [#allocation4], 1 }

</bundles_post_ra>
